<compile_context>
chip_gen: v5e
topology: v5e:2x2
jax: 0.10.0
libtpu: 0.0.40
codegen_flags: <defaults>
</compile_context>

<pallas_src>
import functools

import jax
import jax.numpy as jnp
from jax.experimental import pallas as pl
from jax.experimental.pallas import tpu as pltpu


def _conv_bias_silu_kernel(x_ref, w_ref, b_ref, m_ref, o_ref, patches_ref, *,
                           Cin, W, HW, PAD):
    """Fused 3x3 same-conv + bias + SiLU for one batch sample.

    x_ref:       (1, Cin, HW + 2*PAD)  flat pixel rows with a zero "flat halo"
    w_ref:       (Co, 9*Cin)           taps, column = (ky*3+kx)*Cin + ci
    b_ref:       (Co, 1)               bias (f32)
    m_ref:       (2, HW)               {0,1} masks: row0 = "w-1 exists", row1 = "w+1 exists"
    o_ref:       (1, Co, HW)           channels-first conv output (SiLU applied), lane-dense
    patches_ref: (9*Cin, HW)           im2col scratch, lane-dense pixel columns
    """
    # Load the whole flat row once; upcast so all slicing/relayout happens in f32.
    xv = x_ref[0, :, :].astype(jnp.float32)          # (Cin, HW + 2*PAD)
    m_left = m_ref[0:1, :]                           # valid where source col w-1 exists
    m_right = m_ref[1:2, :]                          # valid where source col w+1 exists

    # --- im2col: each tap is a static lane-offset slice of the halo'd flat row. ---
    # Vertical out-of-range reads land in the halo zeros; horizontal wrap-around is
    # zeroed by the precomputed edge masks. Every store below is a lane-dense
    # (Cin, HW) block write into the scratch.
    for ky in range(3):
        for kx in range(3):
            dy, dx = ky - 1, kx - 1
            off = PAD + dy * W + dx                  # static lane offset of this tap
            tap = xv[:, off:off + HW]                # (Cin, HW)
            if dx == -1:
                tap = tap * m_left
            elif dx == 1:
                tap = tap * m_right
            t = ky * 3 + kx
            patches_ref[t * Cin:(t + 1) * Cin, :] = tap.astype(patches_ref.dtype)

    # --- one plain NN MXU contraction: (Co, K) . (K, HW) -> (Co, HW), f32 accumulate. ---
    acc = jax.lax.dot_general(
        w_ref[...], patches_ref[...],
        dimension_numbers=(((1,), (0,)), ((), ())),
        preferred_element_type=jnp.float32)

    # Bias as a broadcast VPU add (free filler under store-slot slack).
    acc = acc + b_ref[...]

    # SiLU: x * sigmoid(x); sigmoid lands on the EUP slot.
    o_ref[0, :, :] = (acc * jax.nn.sigmoid(acc)).astype(o_ref.dtype)


def _vmem_padded_bytes(shape, dtype):
    """(8,128)/dtype-packing-aware VMEM footprint of one buffer of `shape`."""
    itemsize = jnp.dtype(dtype).itemsize
    packing = max(1, 4 // itemsize)                  # logical rows per 32-bit sublane
    if len(shape) < 2:
        n = int(shape[0]) if shape else 1
        return max(128, -(-n // 128) * 128) * itemsize
    lead = 1
    for d in shape[:-2]:
        lead *= int(d)
    sub = -(-int(shape[-2]) // (8 * packing)) * (8 * packing)
    lanes = -(-int(shape[-1]) // 128) * 128
    return lead * sub * lanes * itemsize


def pixel_shuffle_block(x_nchw, weight, bias, scale_factor=2, *,
                        compute_dtype=jnp.float32):
    """Forward pass of PixelShuffleBlock.

    x_nchw: (N, Cin, H, W)            float32
    weight: (Cout*r^2, Cin, 3, 3)     PyTorch Conv2d layout
    bias:   (Cout*r^2,)
    compute_dtype: dtype of the MXU operands (bf16 recommended for v5e/v6e/v7x
                   production; accumulation is always f32).
    returns (N, Cout, H*r, W*r)       in x_nchw.dtype
    """
    r = scale_factor
    N, Cin, H, W = x_nchw.shape
    Co = weight.shape[0]                  # = Cout * r^2
    Cout = Co // (r * r)
    HW = H * W
    PAD = W + 1                           # flat halo: covers dy = +/-1 row shifts
    HWH = HW + 2 * PAD
    K = 9 * Cin

    # Lane-dense flat input: NCHW -> (N, Cin, H*W) is a pure reshape (no transpose),
    # plus a tiny 1-D zero halo so every tap is a static lane slice in-kernel.
    x_flat = x_nchw.reshape(N, Cin, HW).astype(compute_dtype)
    x_halo = jnp.pad(x_flat, ((0, 0), (0, 0), (PAD, PAD)))

    # weight (Co, Cin, 3, 3) -> (Co, 3, 3, Cin) -> (Co, 9*Cin); bias kept separate (f32).
    w2 = jnp.transpose(weight, (0, 2, 3, 1)).reshape(Co, K).astype(compute_dtype)
    b2 = bias.reshape(Co, 1).astype(jnp.float32)

    # Horizontal-edge validity masks ({0,1}); vertical edges are handled by the halo.
    col = jnp.arange(HW, dtype=jnp.int32) % W
    edge_mask = jnp.stack([(col >= 1).astype(jnp.float32),
                           (col <= W - 2).astype(jnp.float32)], axis=0)   # (2, HW)

    # VMEM budget with padded (8,128)/packing-aware sizes; cap at 32 MiB for v7x
    # (half of its 64 MiB physical VMEM), floor at 4 MiB for Mosaic internal scratch.
    in_b = _vmem_padded_bytes((1, Cin, HWH), compute_dtype)
    w_b = _vmem_padded_bytes((Co, K), compute_dtype)
    bias_b = _vmem_padded_bytes((Co, 1), jnp.float32)
    mask_b = _vmem_padded_bytes((2, HW), jnp.float32)
    out_b = _vmem_padded_bytes((1, Co, HW), x_nchw.dtype)
    scr_b = _vmem_padded_bytes((K, HW), compute_dtype)
    need = 2 * (in_b + w_b + bias_b + mask_b + out_b) + scr_b
    vmem_limit = int(min(32 * 2**20, max(4 * 2**20, 2 * need + (2 << 20))))

    cost = pl.CostEstimate(
        flops=2 * N * Co * HW * K,
        transcendentals=N * Co * HW,
        bytes_accessed=int(x_halo.size * x_halo.dtype.itemsize
                           + w2.size * w2.dtype.itemsize
                           + b2.size * 4 + edge_mask.size * 4
                           + N * Co * HW * jnp.dtype(x_nchw.dtype).itemsize))

    kernel = functools.partial(_conv_bias_silu_kernel, Cin=Cin, W=W, HW=HW, PAD=PAD)

    # TODO(synk): for large N (or production H*W) fold several samples per grid step
    # (block (B, Cin, HWH), scratch (K, B*HW)) and/or add a pixel-tile axis so per-step
    # overhead amortizes while keeping >=2 "parallel" steps for v7x's two TensorCores
    # and per-step tiles under its 64 MiB VMEM.
    conv_flat = pl.pallas_call(
        kernel,
        out_shape=jax.ShapeDtypeStruct((N, Co, HW), x_nchw.dtype),
        grid_spec=pltpu.PrefetchScalarGridSpec(
            num_scalar_prefetch=0,
            grid=(N,),
            in_specs=[
                pl.BlockSpec((1, Cin, HWH), lambda n: (n, 0, 0)),   # flat halo'd input
                pl.BlockSpec((Co, K), lambda n: (0, 0)),            # weights (resident)
                pl.BlockSpec((Co, 1), lambda n: (0, 0)),            # bias
                pl.BlockSpec((2, HW), lambda n: (0, 0)),            # edge masks
            ],
            out_specs=pl.BlockSpec((1, Co, HW), lambda n: (n, 0, 0)),
            scratch_shapes=[pltpu.VMEM((K, HW), compute_dtype)]),
        compiler_params=pltpu.CompilerParams(
            dimension_semantics=("parallel",),
            vmem_limit_bytes=vmem_limit),
        cost_estimate=cost,
    )(x_halo, w2, b2, edge_mask)

    # PixelShuffle straight from the channels-first conv output (one XLA pass);
    # channel index is c*r^2 + dy*r + dx, matching PyTorch.
    y = conv_flat.reshape(N, Cout, r, r, H, W)
    y = jnp.transpose(y, (0, 1, 4, 2, 5, 3)).reshape(N, Cout, H * r, W * r)
    return y


def _reference(x_nchw, weight, bias, r=2):
    """Plain-JAX reference (lax conv + pixel shuffle + silu) for sanity check."""
    out = jax.lax.conv_general_dilated(
        x_nchw, weight, window_strides=(1, 1), padding=((1, 1), (1, 1)),
        dimension_numbers=("NCHW", "OIHW", "NCHW"))
    out = out + bias[None, :, None, None]
    N, Co, H, W = out.shape
    Cout = Co // (r * r)
    out = out.reshape(N, Cout, r, r, H, W)
    out = jnp.transpose(out, (0, 1, 4, 2, 5, 3)).reshape(N, Cout, H * r, W * r)
    return out * jax.nn.sigmoid(out)


if __name__ == "__main__":
    # Small, deterministic setup: in_channels=4, out_channels=4, scale_factor=2.
    key = jax.random.PRNGKey(0)
    k_x, k_w, k_b = jax.random.split(key, 3)

    N, Cin, H, W = 2, 4, 16, 16
    Cout, r = 4, 2
    Co = Cout * r * r

    x = jax.random.normal(k_x, (N, Cin, H, W), dtype=jnp.float32)
    weight = 0.1 * jax.random.normal(k_w, (Co, Cin, 3, 3), dtype=jnp.float32)
    bias = 0.1 * jax.random.normal(k_b, (Co,), dtype=jnp.float32)

    # f32 path: strict check.
    out = jax.block_until_ready(pixel_shuffle_block(x, weight, bias, scale_factor=r))
    ref = jax.block_until_ready(_reference(x, weight, bias, r=r))
    assert out.shape == (N, Cout, H * r, W * r), out.shape
    err = float(jnp.max(jnp.abs(out - ref)))
    assert err < 1e-4, err

    # bf16 MXU-operand path (production dtype on v5e/v6e/v7x): compare against a
    # reference fed the same bf16-rounded operands (both sides accumulate in f32),
    # so the tolerance stays tight.
    out_bf = jax.block_until_ready(
        pixel_shuffle_block(x, weight, bias, scale_factor=r, compute_dtype=jnp.bfloat16))
    ref_bf = jax.block_until_ready(_reference(
        x.astype(jnp.bfloat16).astype(jnp.float32),
        weight.astype(jnp.bfloat16).astype(jnp.float32), bias, r=r))
    err_bf = float(jnp.max(jnp.abs(out_bf - ref_bf)))
    assert err_bf < 5e-3, err_bf

    print("KERNEL_OK")
</pallas_src>

<mosaic_0001>
module attributes {stable_mosaic.version = 11 : i64} {
  func.func @_conv_bias_silu_kernel(%arg0: i32, %arg1: memref<1x4x290xf32, #tpu.memory_space<vmem>>, %arg2: memref<16x36xf32, #tpu.memory_space<vmem>>, %arg3: memref<16x1xf32, #tpu.memory_space<vmem>>, %arg4: memref<2x256xf32, #tpu.memory_space<vmem>>, %arg5: memref<1x16x256xf32, #tpu.memory_space<vmem>>, %arg6: memref<36x256xf32, #tpu.memory_space<vmem>>) attributes {dimension_semantics = [#tpu.dimension_semantics<parallel>], iteration_bounds = array<i64: 2>, scalar_prefetch = 0 : i64, scratch_operands = 1 : i64, tpu.core_type = #tpu.core_type<tc>, window_params = [{transform_indices = @transform_0, window_bounds = array<i64: 1, 4, 290>}, {pipeline_mode = #tpu.pipeline_mode<synchronous>, transform_indices = @transform_1, window_bounds = array<i64: 16, 36>}, {pipeline_mode = #tpu.pipeline_mode<synchronous>, transform_indices = @transform_2, window_bounds = array<i64: 16, 1>}, {pipeline_mode = #tpu.pipeline_mode<synchronous>, transform_indices = @transform_3, window_bounds = array<i64: 2, 256>}, {transform_indices = @transform_4, window_bounds = array<i64: 1, 16, 256>}]} {
    %c0 = arith.constant 0 : index
    %c0_0 = arith.constant 0 : index
    %c0_1 = arith.constant 0 : index
    %0 = vector.load %arg1[%c0, %c0_0, %c0_1] : memref<1x4x290xf32, #tpu.memory_space<vmem>>, vector<1x4x290xf32>
    %1 = vector.shape_cast %0 : vector<1x4x290xf32> to vector<4x290xf32>
    %c0_2 = arith.constant 0 : index
    %c0_3 = arith.constant 0 : index
    %2 = vector.load %arg4[%c0_2, %c0_3] : memref<2x256xf32, #tpu.memory_space<vmem>>, vector<1x256xf32>
    %c1 = arith.constant 1 : index
    %c0_4 = arith.constant 0 : index
    %3 = vector.load %arg4[%c1, %c0_4] : memref<2x256xf32, #tpu.memory_space<vmem>>, vector<1x256xf32>
    %4 = vector.extract_strided_slice %1 {offsets = [0, 0], sizes = [4, 256], strides = [1, 1]} : vector<4x290xf32> to vector<4x256xf32>
    %5 = vector.broadcast %2 : vector<1x256xf32> to vector<4x256xf32>
    %6 = arith.mulf %4, %5 : vector<4x256xf32>
    %c0_5 = arith.constant 0 : index
    %c0_6 = arith.constant 0 : index
    %7 = vector.load %arg6[%c0_5, %c0_6] : memref<36x256xf32, #tpu.memory_space<vmem>>, vector<4x256xf32>
    tpu.vector_store %arg6[%c0_5, %c0_6], %6 {strides = array<i32>} : memref<36x256xf32, #tpu.memory_space<vmem>>, vector<4x256xf32>,
    %8 = vector.extract_strided_slice %1 {offsets = [0, 1], sizes = [4, 256], strides = [1, 1]} : vector<4x290xf32> to vector<4x256xf32>
    %c4 = arith.constant 4 : index
    %c0_7 = arith.constant 0 : index
    %9 = vector.load %arg6[%c4, %c0_7] : memref<36x256xf32, #tpu.memory_space<vmem>>, vector<4x256xf32>
    tpu.vector_store %arg6[%c4, %c0_7], %8 {strides = array<i32>} : memref<36x256xf32, #tpu.memory_space<vmem>>, vector<4x256xf32>,
    %10 = vector.extract_strided_slice %1 {offsets = [0, 2], sizes = [4, 256], strides = [1, 1]} : vector<4x290xf32> to vector<4x256xf32>
    %11 = vector.broadcast %3 : vector<1x256xf32> to vector<4x256xf32>
    %12 = arith.mulf %10, %11 : vector<4x256xf32>
    %c8 = arith.constant 8 : index
    %c0_8 = arith.constant 0 : index
    %13 = vector.load %arg6[%c8, %c0_8] : memref<36x256xf32, #tpu.memory_space<vmem>>, vector<4x256xf32>
    tpu.vector_store %arg6[%c8, %c0_8], %12 {strides = array<i32>} : memref<36x256xf32, #tpu.memory_space<vmem>>, vector<4x256xf32>,
    %14 = vector.extract_strided_slice %1 {offsets = [0, 16], sizes = [4, 256], strides = [1, 1]} : vector<4x290xf32> to vector<4x256xf32>
    %15 = vector.broadcast %2 : vector<1x256xf32> to vector<4x256xf32>
    %16 = arith.mulf %14, %15 : vector<4x256xf32>
    %c12 = arith.constant 12 : index
    %c0_9 = arith.constant 0 : index
    %17 = vector.load %arg6[%c12, %c0_9] : memref<36x256xf32, #tpu.memory_space<vmem>>, vector<4x256xf32>
    tpu.vector_store %arg6[%c12, %c0_9], %16 {strides = array<i32>} : memref<36x256xf32, #tpu.memory_space<vmem>>, vector<4x256xf32>,
    %18 = vector.extract_strided_slice %1 {offsets = [0, 17], sizes = [4, 256], strides = [1, 1]} : vector<4x290xf32> to vector<4x256xf32>
    %c16 = arith.constant 16 : index
    %c0_10 = arith.constant 0 : index
    %19 = vector.load %arg6[%c16, %c0_10] : memref<36x256xf32, #tpu.memory_space<vmem>>, vector<4x256xf32>
    tpu.vector_store %arg6[%c16, %c0_10], %18 {strides = array<i32>} : memref<36x256xf32, #tpu.memory_space<vmem>>, vector<4x256xf32>,
    %20 = vector.extract_strided_slice %1 {offsets = [0, 18], sizes = [4, 256], strides = [1, 1]} : vector<4x290xf32> to vector<4x256xf32>
    %21 = vector.broadcast %3 : vector<1x256xf32> to vector<4x256xf32>
    %22 = arith.mulf %20, %21 : vector<4x256xf32>
    %c20 = arith.constant 20 : index
    %c0_11 = arith.constant 0 : index
    %23 = vector.load %arg6[%c20, %c0_11] : memref<36x256xf32, #tpu.memory_space<vmem>>, vector<4x256xf32>
    tpu.vector_store %arg6[%c20, %c0_11], %22 {strides = array<i32>} : memref<36x256xf32, #tpu.memory_space<vmem>>, vector<4x256xf32>,
    %24 = vector.extract_strided_slice %1 {offsets = [0, 32], sizes = [4, 256], strides = [1, 1]} : vector<4x290xf32> to vector<4x256xf32>
    %25 = vector.broadcast %2 : vector<1x256xf32> to vector<4x256xf32>
    %26 = arith.mulf %24, %25 : vector<4x256xf32>
    %c24 = arith.constant 24 : index
    %c0_12 = arith.constant 0 : index
    %27 = vector.load %arg6[%c24, %c0_12] : memref<36x256xf32, #tpu.memory_space<vmem>>, vector<4x256xf32>
    tpu.vector_store %arg6[%c24, %c0_12], %26 {strides = array<i32>} : memref<36x256xf32, #tpu.memory_space<vmem>>, vector<4x256xf32>,
    %28 = vector.extract_strided_slice %1 {offsets = [0, 33], sizes = [4, 256], strides = [1, 1]} : vector<4x290xf32> to vector<4x256xf32>
    %c28 = arith.constant 28 : index
    %c0_13 = arith.constant 0 : index
    %29 = vector.load %arg6[%c28, %c0_13] : memref<36x256xf32, #tpu.memory_space<vmem>>, vector<4x256xf32>
    tpu.vector_store %arg6[%c28, %c0_13], %28 {strides = array<i32>} : memref<36x256xf32, #tpu.memory_space<vmem>>, vector<4x256xf32>,
    %30 = vector.extract_strided_slice %1 {offsets = [0, 34], sizes = [4, 256], strides = [1, 1]} : vector<4x290xf32> to vector<4x256xf32>
    %31 = vector.broadcast %3 : vector<1x256xf32> to vector<4x256xf32>
    %32 = arith.mulf %30, %31 : vector<4x256xf32>
    %c32 = arith.constant 32 : index
    %c0_14 = arith.constant 0 : index
    %33 = vector.load %arg6[%c32, %c0_14] : memref<36x256xf32, #tpu.memory_space<vmem>>, vector<4x256xf32>
    tpu.vector_store %arg6[%c32, %c0_14], %32 {strides = array<i32>} : memref<36x256xf32, #tpu.memory_space<vmem>>, vector<4x256xf32>,
    %c0_15 = arith.constant 0 : index
    %c0_16 = arith.constant 0 : index
    %34 = vector.load %arg2[%c0_15, %c0_16] : memref<16x36xf32, #tpu.memory_space<vmem>>, vector<16x36xf32>
    %c0_17 = arith.constant 0 : index
    %c0_18 = arith.constant 0 : index
    %35 = vector.load %arg6[%c0_17, %c0_18] : memref<36x256xf32, #tpu.memory_space<vmem>>, vector<36x256xf32>
    %cst = arith.constant dense<0.000000e+00> : vector<16x256xf32>
    %36 = tpu.matmul %34, %35, %cst {dimension_numbers = #tpu.dot_dimension_numbers<[1], [0], [0], [1], [0, 0, 1, 1], [], []>} : vector<16x36xf32>, vector<36x256xf32>, vector<16x256xf32> -> vector<16x256xf32>
    %c0_19 = arith.constant 0 : index
    %c0_20 = arith.constant 0 : index
    %37 = vector.load %arg3[%c0_19, %c0_20] : memref<16x1xf32, #tpu.memory_space<vmem>>, vector<16x1xf32>
    %38 = vector.broadcast %37 : vector<16x1xf32> to vector<16x256xf32>
    %39 = arith.addf %36, %38 : vector<16x256xf32>
    %40 = arith.negf %39 : vector<16x256xf32>
    %41 = math.exp %40 : vector<16x256xf32>
    %cst_21 = arith.constant 1.000000e+00 : f32
    %42 = vector.broadcast %cst_21 : f32 to vector<16x256xf32>
    %43 = arith.addf %42, %41 : vector<16x256xf32>
    %44 = arith.divf %42, %43 : vector<16x256xf32>
    %45 = arith.mulf %39, %44 : vector<16x256xf32>
    %c0_22 = arith.constant 0 : index
    %c0_23 = arith.constant 0 : index
    %c0_24 = arith.constant 0 : index
    %46 = vector.load %arg5[%c0_22, %c0_23, %c0_24] : memref<1x16x256xf32, #tpu.memory_space<vmem>>, vector<1x16x256xf32>
    %47 = vector.shape_cast %46 : vector<1x16x256xf32> to vector<16x256xf32>
    %48 = vector.shape_cast %45 : vector<16x256xf32> to vector<1x16x256xf32>
    tpu.vector_store %arg5[%c0_22, %c0_23, %c0_24], %48 {strides = array<i32>} : memref<1x16x256xf32, #tpu.memory_space<vmem>>, vector<1x16x256xf32>,
    return
  }
  func.func @transform_0(%arg0: i32) -> (i32, i32, i32) {
    %c0_i32 = arith.constant 0 : i32
    %c0_i32_0 = arith.constant 0 : i32
    %c0_i32_1 = arith.constant 0 : i32
    return %arg0, %c0_i32, %c0_i32_0 : i32, i32, i32
  }
  func.func @transform_1(%arg0: i32) -> (i32, i32) {
    %c0_i32 = arith.constant 0 : i32
    %c0_i32_0 = arith.constant 0 : i32
    %c0_i32_1 = arith.constant 0 : i32
    return %c0_i32, %c0_i32_0 : i32, i32
  }
  func.func @transform_2(%arg0: i32) -> (i32, i32) {
    %c0_i32 = arith.constant 0 : i32
    %c0_i32_0 = arith.constant 0 : i32
    %c0_i32_1 = arith.constant 0 : i32
    return %c0_i32, %c0_i32_0 : i32, i32
  }
  func.func @transform_3(%arg0: i32) -> (i32, i32) {
    %c0_i32 = arith.constant 0 : i32
    %c0_i32_0 = arith.constant 0 : i32
    %c0_i32_1 = arith.constant 0 : i32
    return %c0_i32, %c0_i32_0 : i32, i32
  }
  func.func @transform_4(%arg0: i32) -> (i32, i32, i32) {
    %c0_i32 = arith.constant 0 : i32
    %c0_i32_0 = arith.constant 0 : i32
    %c0_i32_1 = arith.constant 0 : i32
    return %arg0, %c0_i32, %c0_i32_0 : i32, i32, i32
  }
}

</mosaic_0001>

<bundles_post_ra>
// kernel: tpu_custom_call.1
= control target key start
LH: loop header
LB: loop body
LE: loop exit
PB: predicated region body
PF: predicated region fallthrough
CT: control target
= control target key end

     0   :  { %9 = vsyncpa [#allocation4], 0  ;;  %s1262_s0 = inlined_call_operand.hbm [shape: f32[2,4,290], index: 0, kind: input, shape index: {}]   ;;  %s1263_s1 = inlined_call_operand.vmem [shape: f32[16,36], index: 1, kind: input, shape index: {}]   ;;  %s1264_s2 = inlined_call_operand.vmem [shape: f32[16,1], index: 2, kind: input, shape index: {}]   ;;  %s1265_s3 = inlined_call_operand.hbm [shape: f32[2,256], index: 3, kind: input, shape index: {}]   ;;  %s1266_s4 = inlined_call_operand.hbm [shape: f32[2,16,256], index: 4, kind: output, shape index: {}]  }
   0x1   :  { %11 = vsyncpa [#allocation4 + $0x1], 0 }
   0x2   :  { %12 = vsyncpa [#allocation7], 0 }
   0x3   :  { %13 = vsyncpa [#allocation5], 0 }
   0x4   :  { %15 = vsyncpa [#allocation5 + $0x1], 0  ;;  %s1036_s15 = smov 0   ;;  %s1038_s16 = smov 0  }
   0x5   :  { %s1040_s17 = smov 0   ;;  %s1042_s18 = smov 0  }
   0x6 LB: > { %s1057_s19 = sadd.s32 4294967295, %s993_s18   ;;  %s736_s20 = sadd.s32 4294967294, %s993_s18   ;;  %s993_s18 = sphi %s1042_s18, %s1276_s18   ;;  %s989_s17 = sphi %s1040_s17, %s1275_s17   ;;  %s985_s16 = sphi %s1038_s16, %s1274_s16   ;;  %s981_s15 = sphi %s1036_s15, %s1273_s15  }
   0x7   : > { %p41_p0 = scmp.ne.s32.totalorder %s985_s16, %s981_s15  ;;  %p42_p1 = scmp.eq.s32.totalorder %s1057_s19, 0 }
   0x8   : > { %p128_p2 = scmp.eq.s32.totalorder %s1057_s19, 1  ;;  %p134_p3 = scmp.eq.s32.totalorder %s736_s20, 1 }
   0x9   : > { %p1066_p4 = por %p42_p1, %p41_p0  ;;  %p737_p5 = scmp.ge.s32.totalorder %s993_s18, 1 }
   0xa   : > { %p1071_p6 = por %p134_p3, %p41_p0  ;;  %p141_p7 = scmp.lt.s32.totalorder %s993_s18, 3 }
   0xb   : > { %s159_s25 = sshll.u32 %s1265_s3, 4  ;;  %s995_s27 = smov [#allocation6]   ;;  %s160_s25 = int_to_ptr.hbm [resolvable:$true] %s159_s25 }
   0xc   : > { %p1079_p8 = pnand %p737_p5, %p141_p7  ;;  %s161_s28 = sshll.u32 %s995_s27, 4  ;;  %s162_s28 = int_to_ptr.vmem [resolvable:$true] %s161_s28 }
   0xd   : > { %s1089_s29 = sadd.s32 1, %s993_s18   ;;  %s28_s30 = sadd.s32 1, %s989_s17 }
   0xe   : > { %p781_p10 = pneg %p1079_p8  ;;  %s25_s5 = ssub.s32 %s993_s18, %s1089_s29 }
   0xf   : > { %p26_p12 = scmp.eq.s32.totalorder %s25_s5, 0  ;;  %p35_p13 = scmp.ne.s32.totalorder %s989_s17, %s985_s16 }
  0x10   : > { %p782_p11 = pnand %p781_p10, %p42_p1  ;;  %p36_p0 = scmp.eq.s32.totalorder %s993_s18, 0 }
  0x11   : > { %p794_p3 = scmp.lt.s32.totalorder %s993_s18, 2  ;;  %p1103_p7 = por %p128_p2, %p35_p13 }
  0x12   : > { %784 = dma.hbm_to_vmem [thread:$0]  (!%p782_p11), %s160_s25, 64, %s162_s28, [#allocation7]  }
  0x13   : > { %s1099_s6 = scalar_select %p26_p12, %s989_s17, %s28_s30  }
  0x14   : > { %p37_p5 = por %p36_p0, %p35_p13  ;;  %s172_s8 = sand.u32 1, %s989_s17  }
  0x15   : > { %s771_s9 = smul.u32 12, %s993_s18  ;;  %s173_s25 = scalar_lea.sflag [#allocation4], %s172_s8 }
  0x16   : > { %s770_s10 = smul.u32 12, %s172_s8  ;;  %p1112_p10 = pnand %p794_p3, %p37_p5 }
  0x17   : > { %s181_s13 = scalar_lea.hbm %s1262_s0, %s771_s9  ;;  %s900_s9 = scalar_lea.hbm %s1262_s0, 24 }
  0x18   : > { %s183_s20 = sshll.u32 %s181_s13, 4  ;;  %s176_s23 = scalar_lea.vmem [#allocation3], %s770_s10  ;;  %s184_s20 = int_to_ptr.hbm [resolvable:$true] %s183_s20 }
  0x19   : > { %s185_s24 = sshll.u32 %s176_s23, 4  ;;  %s893_s27 = sshra.s32 %s184_s20, 4  ;;  %s186_s24 = int_to_ptr.vmem [resolvable:$true] %s185_s24  ;;  %s894_s27 = int_to_ptr.hbm [resolvable:$true] %s893_s27 }
  0x1a   : > { %s895_s28 = scalar_lea.hbm %s894_s27, 12  ;;  %p897_p11 = pneg %p1112_p10 }
  0x1b   : > { %p896_p2 = scmp.ne.s32.totalorder %s894_s27, %s895_s28  ;;  %p901_p0 = scmp.lt.s32.totalorder %s894_s27, %s1262_s0 }
  0x1c   : > { %p902_p3 = scmp.lt.s32.totalorder %s900_s9, %s895_s28 }
  0x1d   : > { %p898_p12 = pnand %p897_p11, %p896_p2 }
  0x1e   : > { %p903_p5 = por %p902_p3, %p901_p0 }
  0x1f   : > { %p899_p13 = pneg %p898_p12 }
  0x21   : > { %p904_p9 = pnand %p903_p5, %p899_p13 }
  0x23   : > { %907 = shalt.err (!%p904_p9)
}
  0x24   : > { %788 = dma.hbm_to_vmem [thread:$0]  (!%p1112_p10), %s184_s20, 192, %s186_s24, %s173_s25  }
  0x25   : > { %194 = sbr.rel (%p1079_p8) target bundleno = 532 (0x214), region = 36  ;;  %s1129_s8 = sand.u32 (!%p1079_p8), 1, %s985_s16  }
  0x26   : > { %s772_s10 = smul.u32 (!%p1079_p8), 12, %s1129_s8  ;;  %s197_s13 = scalar_lea.sflag (!%p1079_p8), [#allocation4], %s1129_s8 }
  0x28   : > { %s1133_s23 = scalar_lea.vmem (!%p1079_p8), [#allocation3], %s772_s10 }
  0x2a   : > { %968 = dma.done.wait (%p1066_p4), %s197_s13, 192  }
  0x2b   : > { %970 = vsyncadd (%p1066_p4), %s197_s13, 4294967104 }
  0x2c   : > { %972 = dma.done.wait (%p42_p1), [#allocation7], 64  }
  0x2d   : > { %974 = vsyncadd (%p42_p1), [#allocation7], 4294967232  ;;  %v235_v0 = vld [vmem:[#allocation6 + $0x1] ss:$2 sm:$0x3]  ;;  %vm240_vm0 = vcmask 1043456  }
  0x2e   : > { %v233_v1 = vld [vmem:[#allocation6] ss:$2 sm:$0x3]  ;;  %v275_v2 = vperm.slane %v235_v0, 0  ;;  %v276_v3 = vperm.slane %v235_v0, 1  ;;  %v1144_v8 = vld [vmem:[%s1133_s23] sm:$0xff] }
  0x2f   : > { %v237_v4 = vperm.slane %v233_v1, 0  ;;  %v238_v5 = vperm.slane %v233_v1, 1  ;;  %s996_s21 = smov 2   ;;  %s997_s26 = smov 18   ;;  %v1152_v14 = vld [vmem:[%s1133_s23 + $0x8] sm:$0xf] }
  0x30   : > { %v277_v6 = vrot.slane %v276_v3, 4  ;;  %s998_s14 = smov 34   ;;  %s999_s20 = smov 16   ;;  %257 = vst [vmem:[#allocation1 + $0x11] ss:$2 sm:$0xff] %v1152_v14  ;;  %vm282_vm1 = vcmask 15360  }
  0x31   : > { %v239_v7 = vrot.slane %v238_v5, 4  ;;  %s1000_s24 = smov 32   ;;  %vm312_vm2 = vcmask 130048   ;;  %s1001_s25 = smov 126   ;;  %vm362_vm3 = vcmask 146432   ;;  %vm393_vm4 = vcmask 261120  }
  0x32   : > { %v278_v9 = vsel %vm240_vm0, %v275_v2, %v277_v6  ;;  %s1002_s27 = smov 112   ;;  %s1003_s28 = smov 111   ;;  %vm443_vm5 = vcmask 277504   ;;  %vm302_vm6 = vcmask 1031168   ;;  %vm333_vm7 = vcmask 916480  }
  0x33   : > { %v241_v10 = vsel %vm240_vm0, %v237_v4, %v239_v7  ;;  %279 = vrot.lane.b32.xlu0 %v278_v9, %s996_s21  ;;  %359 = vrot.lane.b32.xlu1 %v278_v9, %s997_s26  ;;  %s1004_s30 = smov 110   ;;  %s1005_s5 = smov 96   ;;  %vm352_vm8 = vcmask 908288   ;;  %vm383_vm9 = vcmask 900096   ;;  %vm413_vm10 = vcmask 785408  }
  0x34   : > { %v243_v11 = vmul.f32 %v241_v10, %v1144_v8  ;;  %440 = vrot.lane.b32.xlu2 %v278_v9, %s998_s14  ;;  %s1006_s9 = smov 95   ;;  %s1007_s11 = smov 94   ;;  %vm433_vm11 = vcmask 777216   ;;  %vm463_vm12 = vcmask 769024   ;;  %vm267_vm13 = vcmask 1039360  }
  0x35   : > { %s1008_s12 = smov 127   ;;  %vm494_vm14 = vcmask 293888   ;;  %s638_s10 = scalar_lea.sflag [#allocation5], %s1129_s8 }
  0x36   : > { %245 = vst [vmem:[#allocation1] ss:$2 sm:$0xff] %v243_v11  ;;  %s943_s14 = scalar_lea.hbm %s1266_s4, 64 }
  0x37   : > { %v1155_v17 = vld.sshfl [vmem:[#allocation1 + $0x10] sm:$0xff pattern:$0x75316420] }
  0x3b   : > { %309 = vrot.lane.b32.xlu0 %v241_v10, %s999_s20  ;;  %390 = vrot.lane.b32.xlu1 %v241_v10, %s1000_s24 }
  0x3d   : > { %v246_v12 = vld.sshfl [vmem:[#allocation1] sm:$0xff pattern:$0x75316420]  ;;  %v247_v13 = vld.sshfl [vmem:[#allocation1 + $0x8] sm:$0xff pattern:$0x75316420] }
  0x3e   : > { %255 = vst [vmem:[#allocation1 + $0x1] ss:$2 sm:$0xff] %v1144_v8 }
  0x3f   : > { %250 = vst [vmem:[#allocation2 + $0x30] sm:$0xf] %v246_v12 }
  0x40   : > { %251 = vst [vmem:[#allocation2] sm:$0xf] %v247_v13 }
  0x45   : > { %v1157_v18 = vld.sshfl [vmem:[#allocation1] sm:$0xff pattern:$0x75316420]  ;;  %v1159_v19 = vld.sshfl [vmem:[#allocation1 + $0x8] sm:$0xff pattern:$0x75316420] }
  0x8e   : > { %v441_v50 = vpop.permute.xlu2 %440 }
  0x8f   : > { %v442_v52 = vrot.slane %v441_v50, 4 }
  0x91   : > { %v448_v55 = vmul.f32 %v442_v52, %v1152_v14  ;;  %v444_v56 = vsel %vm443_vm5, %v442_v52, %v441_v50 }
  0x92   : > { %v447_v58 = vmul.f32 %v444_v56, %v1144_v8 }
  0xa5   : > { %v280_v15 = vpop.permute.xlu0 %279  ;;  %v360_v31 = vpop.permute.xlu1 %359 }
  0xa6   : > { %v281_v16 = vrot.slane %v280_v15, 4  ;;  %v361_v33 = vrot.slane %v360_v31, 4 }
  0xa8   : > { %v283_v20 = vsel %vm282_vm1, %v281_v16, %v280_v15  ;;  %v287_v21 = vmul.f32 %v281_v16, %v1152_v14  ;;  %v367_v36 = vmul.f32 %v361_v33, %v1152_v14  ;;  %v363_v37 = vsel %vm362_vm3, %v361_v33, %v360_v31 }
  0xa9   : > { %v286_v22 = vmul.f32 %v283_v20, %v1144_v8  ;;  %v366_v40 = vmul.f32 %v363_v37, %v1144_v8 }
  0xaa   : > { %292 = vst [vmem:[#allocation1 + $0x10] ss:$2 sm:$0xff] %v287_v21 }
  0xab   : > { %290 = vst [vmem:[#allocation1] ss:$2 sm:$0xff] %v286_v22 }
  0xad   : > { %v310_v23 = vpop.permute.xlu0 %309  ;;  %v391_v38 = vpop.permute.xlu1 %390 }
  0xae   : > { %v311_v24 = vrot.slane %v310_v23, 4  ;;  %v392_v41 = vrot.slane %v391_v38, 4 }
  0xb0   : > { %v313_v25 = vsel %vm312_vm2, %v311_v24, %v310_v23  ;;  %v317_v26 = vmul.f32 %v311_v24, %v1152_v14  ;;  %v398_v44 = vmul.f32 %v392_v41, %v1152_v14  ;;  %v394_v45 = vsel %vm393_vm4, %v392_v41, %v391_v38 }
  0xb1   : > { %v316_v27 = vmul.f32 %v313_v25, %v1144_v8  ;;  %v295_v28 = vld.sshfl [vmem:[#allocation1 + $0x10] sm:$0xff pattern:$0x75316420]  ;;  %v397_v47 = vmul.f32 %v394_v45, %v1144_v8 }
  0xb2   : > { %300 = vrot.lane.b32.xlu1 %v295_v28, %s1001_s25  ;;  %323 = vst [vmem:[#allocation1 + $0x11] ss:$2 sm:$0xff] %v317_v26  ;;  %v294_v29 = vld.sshfl [vmem:[#allocation1 + $0x8] sm:$0xff pattern:$0x75316420]  ;;  %v482_v28 = vld [vmem:[%s1264_s2] sm:$0xff] }
  0xb3   : > { %298 = vrot.lane.b32.xlu0 %v294_v29, %s1001_s25  ;;  %v293_v30 = vld.sshfl [vmem:[#allocation1] sm:$0xff pattern:$0x75316420]  ;;  %v1009_v29 = vmov 0  }
  0xb4   : > { %296 = vrot.lane.b32.xlu2 %v293_v30, %s1001_s25  ;;  %321 = vst [vmem:[#allocation1 + $0x1] ss:$2 sm:$0xff] %v316_v27  ;;  %v483_v27 = vld [vmem:[%s1264_s2 + $0x8] sm:$0xff]  ;;  %846 = vset.pattern.permute.xlu0 %v1009_v29 }
  0xb5   : > { %845 = vset.pattern.permute.xlu2 %v1009_v29 }
  0xb9   : > { %v326_v32 = vld.sshfl [vmem:[#allocation1 + $0x10] sm:$0xff pattern:$0x75316420] }
  0xba   : > { %331 = vrot.lane.b32.xlu1 %v326_v32, %s1002_s27  ;;  %342 = vst [vmem:[#allocation1 + $0x10] ss:$2 sm:$0xff] %v1152_v14 }
  0xbb   : > { %v325_v34 = vld.sshfl [vmem:[#allocation1 + $0x8] sm:$0xff pattern:$0x75316420]  ;;  %v324_v35 = vld.sshfl [vmem:[#allocation1] sm:$0xff pattern:$0x75316420] }
  0xbc   : > { %329 = vrot.lane.b32.xlu0 %v325_v34, %s1002_s27  ;;  %327 = vrot.lane.b32.xlu2 %v324_v35, %s1002_s27  ;;  %340 = vst [vmem:[#allocation1] ss:$2 sm:$0xff] %v1144_v8  ;;  %s743_s27 = sshll.u32 %s1129_s8, 5 }
  0xc1   : > { %v345_v39 = vld.sshfl [vmem:[#allocation1 + $0x10] sm:$0xff pattern:$0x75316420] }
  0xc2   : > { %350 = vrot.lane.b32.xlu1 %v345_v39, %s1003_s28  ;;  %373 = vst [vmem:[#allocation1 + $0x11] ss:$2 sm:$0xff] %v367_v36 }
  0xc3   : > { %v344_v42 = vld.sshfl [vmem:[#allocation1 + $0x8] sm:$0xff pattern:$0x75316420]  ;;  %v343_v43 = vld.sshfl [vmem:[#allocation1] sm:$0xff pattern:$0x75316420] }
  0xc4   : > { %348 = vrot.lane.b32.xlu0 %v344_v42, %s1003_s28  ;;  %346 = vrot.lane.b32.xlu2 %v343_v43, %s1003_s28  ;;  %371 = vst [vmem:[#allocation1 + $0x1] ss:$2 sm:$0xff] %v366_v40  ;;  %s759_s28 = sshll.u32 %s1057_s19, 5 }
  0xc5   : > { %s649_s19 = scalar_lea.hbm %s1266_s4, %s759_s28 }
  0xc9   : > { %v376_v46 = vld.sshfl [vmem:[#allocation1 + $0x10] sm:$0xff pattern:$0x75316420] }
  0xca   : > { %381 = vrot.lane.b32.xlu1 %v376_v46, %s1004_s30  ;;  %403 = vst [vmem:[#allocation1 + $0x10] ss:$2 sm:$0xff] %v398_v44 }
  0xcb   : > { %v375_v48 = vld.sshfl [vmem:[#allocation1 + $0x8] sm:$0xff pattern:$0x75316420]  ;;  %v374_v49 = vld.sshfl [vmem:[#allocation1] sm:$0xff pattern:$0x75316420] }
  0xcc   : > { %379 = vrot.lane.b32.xlu0 %v375_v48, %s1004_s30  ;;  %377 = vrot.lane.b32.xlu2 %v374_v49, %s1004_s30  ;;  %401 = vst [vmem:[#allocation1] ss:$2 sm:$0xff] %v397_v47 }
  0xd1   : > { %v406_v51 = vld.sshfl [vmem:[#allocation1 + $0x10] sm:$0xff pattern:$0x75316420] }
  0xd2   : > { %411 = vrot.lane.b32.xlu1 %v406_v51, %s1005_s5  ;;  %423 = vst [vmem:[#allocation1 + $0x11] ss:$2 sm:$0xff] %v1152_v14 }
  0xd3   : > { %v405_v53 = vld.sshfl [vmem:[#allocation1 + $0x8] sm:$0xff pattern:$0x75316420]  ;;  %v404_v54 = vld.sshfl [vmem:[#allocation1] sm:$0xff pattern:$0x75316420] }
  0xd4   : > { %409 = vrot.lane.b32.xlu0 %v405_v53, %s1005_s5  ;;  %407 = vrot.lane.b32.xlu2 %v404_v54, %s1005_s5  ;;  %421 = vst [vmem:[#allocation1 + $0x1] ss:$2 sm:$0xff] %v1144_v8  ;;  %v470_v53 = vld [vmem:[%s1263_s1] sm:$0xff]  ;;  %v471_v54 = vld [vmem:[%s1263_s1 + $0x8] sm:$0xff] }
  0xd9   : > { %v426_v57 = vld.sshfl [vmem:[#allocation1 + $0x10] sm:$0xff pattern:$0x75316420] }
  0xda   : > { %431 = vrot.lane.b32.xlu1 %v426_v57, %s1006_s9  ;;  %453 = vst [vmem:[#allocation1 + $0x10] ss:$2 sm:$0xff] %v448_v55 }
  0xdb   : > { %v425_v59 = vld.sshfl [vmem:[#allocation1 + $0x8] sm:$0xff pattern:$0x75316420]  ;;  %v424_v60 = vld.sshfl [vmem:[#allocation1] sm:$0xff pattern:$0x75316420] }
  0xdc   : > { %429 = vrot.lane.b32.xlu0 %v425_v59, %s1006_s9  ;;  %427 = vrot.lane.b32.xlu2 %v424_v60, %s1006_s9  ;;  %451 = vst [vmem:[#allocation1] ss:$2 sm:$0xff] %v447_v58  ;;  %s230_s9 = scalar_lea.vmem [#allocation8], %s743_s27 }
  0xe1   : > { %v456_v61 = vld.sshfl [vmem:[#allocation1 + $0x10] sm:$0xff pattern:$0x75316420] }
  0xe2   : > { %461 = vrot.lane.b32.xlu1 %v456_v61, %s1007_s11 }
  0xe3   : > { %v455_v62 = vld.sshfl [vmem:[#allocation1 + $0x8] sm:$0xff pattern:$0x75316420]  ;;  %v454_v63 = vld.sshfl [vmem:[#allocation1] sm:$0xff pattern:$0x75316420] }
  0xe4   : > { %459 = vrot.lane.b32.xlu0 %v455_v62, %s1007_s11  ;;  %457 = vrot.lane.b32.xlu2 %v454_v63, %s1007_s11  ;;  %s650_s11 = sshll.u32 %s230_s9, 4  ;;  %s651_s11 = int_to_ptr.vmem [resolvable:$true] %s650_s11 }
  0xea   : > { %265 = vrot.lane.b32.xlu1 %v1155_v17, %s1008_s12 }
  0xec   : > { %263 = vrot.lane.b32.xlu0 %v1159_v19, %s1008_s12  ;;  %261 = vrot.lane.b32.xlu2 %v1157_v18, %s1008_s12  ;;  %s652_s12 = sshll.u32 %s649_s19, 4  ;;  %s653_s12 = int_to_ptr.hbm [resolvable:$true] %s652_s12 }
  0xed   : > { %s937_s13 = sshra.s32 %s653_s12, 4  ;;  %s938_s13 = int_to_ptr.hbm [resolvable:$true] %s937_s13 }
  0xee   : > { %s939_s23 = scalar_lea.hbm %s938_s13, 32  ;;  %p944_p9 = scmp.lt.s32.totalorder %s938_s13, %s1266_s4 }
  0xef   : > { %p940_p1 = scmp.ne.s32.totalorder %s938_s13, %s939_s23  ;;  %p945_p10 = scmp.lt.s32.totalorder %s943_s14, %s939_s23 }
  0xf1   : > { %p941_p4 = pnand %p940_p1, %p1103_p7  ;;  %p946_p2 = por %p945_p10, %p944_p9 }
  0xf3   : > { %p942_p8 = pneg %p941_p4 }
  0xf4   : > { %491 = vperm.xlu0 %846, %v483_v27   ;;  %486 = vperm.xlu2 %845, %v482_v28  }
  0xf5   : > { %p947_p11 = pnand %p946_p2, %p942_p8 }
 0x10e   : > { %v297_v0 = vpop.permute.xlu2 %296 }
 0x116   : > { %v328_v1 = vpop.permute.xlu2 %327 }
 0x11e   : > { %v347_v6 = vpop.permute.xlu2 %346 }
 0x124   : > { %v301_v2 = vpop.permute.xlu1 %300 }
 0x125   : > { %v299_v3 = vpop.permute.xlu0 %298 }
 0x126   : > { %v303_v4 = vsel %vm302_vm6, %v297_v0, %v299_v3  ;;  %v304_v5 = vsel %vm302_vm6, %v299_v3, %v301_v2  ;;  %v378_v12 = vpop.permute.xlu2 %377 }
 0x127   : > { %307 = vst [vmem:[#allocation2 + $0x18] sm:$0xf] %v303_v4 }
 0x128   : > { %308 = vst [vmem:[#allocation2 + $0x10] sm:$0xf] %v304_v5 }
 0x12c   : > { %v332_v7 = vpop.permute.xlu1 %331 }
 0x12e   : > { %v330_v8 = vpop.permute.xlu0 %329  ;;  %v408_v20 = vpop.permute.xlu2 %407 }
 0x12f   : > { %v334_v9 = vsel %vm333_vm7, %v328_v1, %v330_v8  ;;  %v335_v10 = vsel %vm333_vm7, %v330_v8, %v332_v7 }
 0x130   : > { %338 = vst [vmem:[#allocation2 + $0x18] sm:$0xf0] %v334_v9 }
 0x131   : > { %339 = vst [vmem:[#allocation2 + $0x10] sm:$0xf0] %v335_v10 }
 0x134   : > { %v351_v11 = vpop.permute.xlu1 %350 }
 0x136   : > { %v349_v13 = vpop.permute.xlu0 %348  ;;  %v428_v25 = vpop.permute.xlu2 %427 }
 0x137   : > { %v353_v14 = vsel %vm352_vm8, %v347_v6, %v349_v13  ;;  %v354_v15 = vsel %vm352_vm8, %v349_v13, %v351_v11  ;;  %v474_v49 = vld [vmem:[#allocation2 + $0x18] sm:$0xff] }
 0x138   : > { %357 = vst [vmem:[#allocation2 + $0x48] sm:$0xf] %v353_v14  ;;  %v475_v50 = vld [vmem:[#allocation2 + $0x10] sm:$0xff] }
 0x139   : > { %358 = vst [vmem:[#allocation2 + $0x28] sm:$0xf] %v354_v15 }
 0x13c   : > { %v382_v16 = vpop.permute.xlu1 %381 }
 0x13e   : > { %v380_v17 = vpop.permute.xlu0 %379  ;;  %v458_v33 = vpop.permute.xlu2 %457 }
 0x13f   : > { %v384_v18 = vsel %vm383_vm9, %v378_v12, %v380_v17  ;;  %v385_v19 = vsel %vm383_vm9, %v380_v17, %v382_v16 }
 0x140   : > { %388 = vst [vmem:[#allocation2 + $0x48] sm:$0xf0] %v384_v18 }
 0x141   : > { %389 = vst [vmem:[#allocation2 + $0x28] sm:$0xf0] %v385_v19 }
 0x144   : > { %v412_v21 = vpop.permute.xlu1 %411 }
 0x146   : > { %v410_v22 = vpop.permute.xlu0 %409  ;;  %v262_v39 = vpop.permute.xlu2 %261 }
 0x147   : > { %v414_v23 = vsel %vm413_vm10, %v408_v20, %v410_v22  ;;  %v415_v24 = vsel %vm413_vm10, %v410_v22, %v412_v21  ;;  %v476_v47 = vld [vmem:[#allocation2 + $0x48] sm:$0xff] }
 0x148   : > { %418 = vst [vmem:[#allocation2 + $0x8] sm:$0xf] %v414_v23  ;;  %v477_v48 = vld [vmem:[#allocation2 + $0x28] sm:$0xff] }
 0x149   : > { %419 = vst [vmem:[#allocation2 + $0x20] sm:$0xf] %v415_v24 }
 0x14c   : > { %v432_v26 = vpop.permute.xlu1 %431 }
 0x14e   : > { %v430_v30 = vpop.permute.xlu0 %429  ;;  %v487_v55 = vpop.permute.xlu2 %486 }
 0x14f   : > { %v434_v31 = vsel %vm433_vm11, %v428_v25, %v430_v30  ;;  %v435_v32 = vsel %vm433_vm11, %v430_v30, %v432_v26 }
 0x150   : > { %438 = vst [vmem:[#allocation2 + $0x8] sm:$0xf0] %v434_v31 }
 0x151   : > { %439 = vst [vmem:[#allocation2 + $0x20] sm:$0xf0] %v435_v32 }
 0x154   : > { %v462_v34 = vpop.permute.xlu1 %461 }
 0x156   : > { %v460_v35 = vpop.permute.xlu0 %459 }
 0x157   : > { %v464_v36 = vsel %vm463_vm12, %v458_v33, %v460_v35  ;;  %v465_v37 = vsel %vm463_vm12, %v460_v35, %v462_v34  ;;  %v478_v45 = vld [vmem:[#allocation2 + $0x8] sm:$0xff] }
 0x158   : > { %468 = vst [vmem:[#allocation2 + $0x40] sm:$0xf] %v464_v36  ;;  %v479_v46 = vld [vmem:[#allocation2 + $0x20] sm:$0xff] }
 0x159   : > { %469 = vst [vmem:[#allocation2 + $0x38] sm:$0xf] %v465_v37 }
 0x15c   : > { %v266_v38 = vpop.permute.xlu1 %265 }
 0x15e   : > { %v264_v40 = vpop.permute.xlu0 %263 }
 0x15f   : > { %v269_v41 = vsel %vm267_vm13, %v264_v40, %v266_v38  ;;  %v268_v42 = vsel %vm267_vm13, %v262_v39, %v264_v40  ;;  %v480_v43 = vld [vmem:[#allocation2 + $0x40] sm:$0xf] }
 0x160   : > { %273 = vst [vmem:[#allocation2] sm:$0xf0] %v269_v41  ;;  %744 = vmatpush.msk.msra.mxu0 %vm240_vm0, %v480_v43  ;;  %760 = vmatpush.msk.msra.mxu2 %vm240_vm0, %v480_v43  ;;  %v481_v44 = vld [vmem:[#allocation2 + $0x38] sm:$0xf] }
 0x161   : > { %272 = vst [vmem:[#allocation2 + $0x30] sm:$0xf0] %v268_v42  ;;  %747 = vmatpush.msk.msra.mxu1 %vm240_vm0, %v481_v44  ;;  %765 = vmatpush.msk.msra.mxu3 %vm240_vm0, %v481_v44 }
 0x162   : > { %519 = vmatpush.msra.mxu0 %v478_v45  ;;  %761 = vmatpush.msra.mxu2 %v478_v45 }
 0x163   : > { %542 = vmatpush.msra.mxu1 %v479_v46  ;;  %766 = vmatpush.msra.mxu3 %v479_v46 }
 0x164   : > { %520 = vmatpush.msra.mxu0 %v476_v47  ;;  %762 = vmatpush.msra.mxu2 %v476_v47 }
 0x165   : > { %543 = vmatpush.msra.mxu1 %v477_v48  ;;  %767 = vmatpush.msra.mxu3 %v477_v48 }
 0x166   : > { %521 = vmatpush.msra.mxu0 %v474_v49  ;;  %763 = vmatpush.msra.mxu2 %v474_v49  ;;  %v492_v62 = vpop.permute.xlu0 %491 }
 0x167   : > { %544 = vmatpush.msra.mxu1 %v475_v50  ;;  %768 = vmatpush.msra.mxu3 %v475_v50  ;;  %v473_v51 = vld [vmem:[#allocation2] sm:$0xff] }
 0x168   : > { %v472_v52 = vld [vmem:[#allocation2 + $0x30] sm:$0xff] }
 0x169   : > { %522 = vmatpush.msra.mxu0 %v472_v52  ;;  %764 = vmatpush.msra.mxu2 %v472_v52 }
 0x16a   : > { %545 = vmatpush.msra.mxu1 %v473_v51  ;;  %769 = vmatpush.msra.mxu3 %v473_v51 }
 0x16b   : > { %745 = vmatmul.msk.f32.vlgmr.msra.gmra.mxu0 %vm494_vm14, %v470_v53  ;;  %746 = vmatmul.msk.f32.vlgmr.msra.gmra.mxu2 %vm494_vm14, %v471_v54 }
 0x16c   : > { %748 = vmatmul.msk.f32.vlgmr.msra.gmra.mxu1 %vm494_vm14, %v470_v53  ;;  %749 = vmatmul.msk.f32.vlgmr.msra.gmra.mxu3 %vm494_vm14, %v471_v54 }
 0x1e8   : > { %v524_v56 = vpop.f32.mrf.mxu0 }
 0x1e9   : > { %v547_v57 = vpop.f32.mrf.mxu1  ;;  %v1194_v58 = vadd.f32 %v524_v56, %v487_v55 }
 0x1ea   : > { %v1196_v59 = vadd.f32 %v547_v57, %v487_v55 }
 0x1eb   : > { %v750_v60 = vmul.f32 -1.442695, %v1194_v58 }
 0x1ec   : > { %v751_v61 = vmul.f32 -1.442695, %v1196_v59 }
 0x1ed   : > { %847 = vpow2.f32 %v750_v60 }
 0x1ee   : > { %849 = vpow2.f32 %v751_v61  ;;  %v527_v63 = vpop.f32.mrf.mxu2 }
 0x1ef   : > { %v550_v0 = vpop.f32.mrf.mxu3  ;;  %v1200_v1 = vadd.f32 %v527_v63, %v492_v62 }
 0x1f0   : > { %v1202_v2 = vadd.f32 %v550_v0, %v492_v62 }
 0x1f1   : > { %v752_v3 = vmul.f32 -1.442695, %v1200_v1 }
 0x1f2   : > { %v753_v4 = vmul.f32 -1.442695, %v1202_v2 }
 0x1f3   : > { %v848_v5 = vpop.eup %847  ;;  %851 = vpow2.f32 %v752_v3 }
 0x1f4   : > { %v850_v6 = vpop.eup %849  ;;  %v565_v7 = vadd.f32 1.0, %v848_v5  ;;  %853 = vpow2.f32 %v753_v4 }
 0x1f5   : > { %v566_v8 = vadd.f32 1.0, %v850_v6 }
 0x1f6   : > { %855 = vrcp.f32 %v565_v7  ;;  %v578_v18 = vand.u32 2147483647, %v565_v7  ;;  %v580_v19 = vand.u32 2147483648, %v565_v7  ;;  %vm574_vm15 = vweird.f32 %v565_v7 }
 0x1f7   : > { %857 = vrcp.f32 %v566_v8  ;;  %v593_v21 = vand.u32 2147483647, %v566_v8  ;;  %v595_v22 = vand.u32 2147483648, %v566_v8  ;;  %vm589_vm1 = vweird.f32 %v566_v8 }
 0x1f8   : > { %vm579_vm3 = vcmp.eq.f32.partialorder %v578_v18, 8.507059e+37  ;;  %v581_v28 = vor.u32 1.1754944e-38, %v580_v19 }
 0x1f9   : > { %v852_v9 = vpop.eup %851  ;;  %vm594_vm4 = vcmp.eq.f32.partialorder %v593_v21, 8.507059e+37  ;;  %v596_v31 = vor.u32 1.1754944e-38, %v595_v22 }
 0x1fa   : > { %v854_v10 = vpop.eup %853  ;;  %v1206_v11 = vadd.f32 1.0, %v852_v9 }
 0x1fb   : > { %v1208_v12 = vadd.f32 1.0, %v854_v10 }
 0x1fc   : > { %v856_v13 = vpop.eup %855  ;;  %859 = vrcp.f32 %v1206_v11  ;;  %v608_v35 = vand.u32 2147483647, %v1206_v11  ;;  %v610_v36 = vand.u32 2147483648, %v1206_v11  ;;  %vm604_vm9 = vweird.f32 %v1206_v11 }
 0x1fd   : > { %v858_v14 = vpop.eup %857  ;;  %v570_v15 = vmul.f32 %v856_v13, %v565_v7  ;;  %861 = vrcp.f32 %v1208_v12  ;;  %vm575_vm0 = vweird.f32 %v856_v13  ;;  %v625_v40 = vand.u32 2147483648, %v1208_v12 }
 0x1fe   : > { %v585_v16 = vmul.f32 %v858_v14, %v566_v8  ;;  %vm590_vm2 = vweird.f32 %v858_v14  ;;  %vm576_vm5 = vmor %vm574_vm15, %vm575_vm0  ;;  %v623_v46 = vand.u32 2147483647, %v1208_v12  ;;  %vm619_vm10 = vweird.f32 %v1208_v12 }
 0x1ff   : > { %v571_v17 = vsub.f32 1.0, %v570_v15  ;;  %vm591_vm6 = vmor %vm589_vm1, %vm590_vm2  ;;  %v611_v49 = vor.u32 1.1754944e-38, %v610_v36  ;;  %v626_v50 = vor.u32 1.1754944e-38, %v625_v40  ;;  %vm609_vm13 = vcmp.eq.f32.partialorder %v608_v35, 8.507059e+37 }
 0x200   : > { %v586_v20 = vsub.f32 1.0, %v585_v16  ;;  %vm624_vm14 = vcmp.eq.f32.partialorder %v623_v46, 8.507059e+37 }
 0x201   : > { %v572_v23 = vmul.f32 %v856_v13, %v571_v17 }
 0x202   : > { %v860_v24 = vpop.eup %859  ;;  %v587_v25 = vmul.f32 %v858_v14, %v586_v20 }
 0x203   : > { %v862_v26 = vpop.eup %861  ;;  %v573_v27 = vadd.f32 %v856_v13, %v572_v23  ;;  %v600_v29 = vmul.f32 %v860_v24, %v1206_v11  ;;  %vm605_vm7 = vweird.f32 %v860_v24 }
 0x204   : > { %v588_v30 = vadd.f32 %v858_v14, %v587_v25  ;;  %v615_v32 = vmul.f32 %v862_v26, %v1208_v12  ;;  %vm620_vm8 = vweird.f32 %v862_v26  ;;  %vm606_vm11 = vmor %vm604_vm9, %vm605_vm7 }
 0x205   : > { %v577_v33 = vsel %vm576_vm5, %v856_v13, %v573_v27  ;;  %v601_v34 = vsub.f32 1.0, %v600_v29  ;;  %vm621_vm12 = vmor %vm619_vm10, %vm620_vm8 }
 0x206   : > { %v592_v37 = vsel %vm591_vm6, %v858_v14, %v588_v30  ;;  %v582_v38 = vsel %vm579_vm3, %v581_v28, %v577_v33  ;;  %v616_v39 = vsub.f32 1.0, %v615_v32 }
 0x207   : > { %v597_v41 = vsel %vm594_vm4, %v596_v31, %v592_v37  ;;  %v629_v42 = vmul.f32 %v582_v38, %v1194_v58  ;;  %v602_v43 = vmul.f32 %v860_v24, %v601_v34 }
 0x208   : > { %v630_v44 = vmul.f32 %v597_v41, %v1196_v59  ;;  %v617_v45 = vmul.f32 %v862_v26, %v616_v39 }
 0x209   : > { %633 = vst [vmem:[%s230_s9] sm:$0xff] %v629_v42  ;;  %v603_v47 = vadd.f32 %v860_v24, %v602_v43 }
 0x20a   : > { %634 = vst [vmem:[%s230_s9 + $0x8] sm:$0xff] %v630_v44  ;;  %v618_v48 = vadd.f32 %v862_v26, %v617_v45 }
 0x20b   : > { %v607_v51 = vsel %vm606_vm11, %v860_v24, %v603_v47 }
 0x20c   : > { %v622_v52 = vsel %vm621_vm12, %v862_v26, %v618_v48  ;;  %v612_v53 = vsel %vm609_vm13, %v611_v49, %v607_v51 }
 0x20d   : > { %v627_v54 = vsel %vm624_vm14, %v626_v50, %v622_v52  ;;  %v631_v55 = vmul.f32 %v612_v53, %v1200_v1 }
 0x20e   : > { %v632_v56 = vmul.f32 %v627_v54, %v1202_v2 }
 0x20f   : > { %635 = vst [vmem:[%s230_s9 + $0x10] sm:$0xff] %v631_v55 }
 0x210   : > { %636 = vst [vmem:[%s230_s9 + $0x18] sm:$0xff] %v632_v56 }
 0x211   : > { %950 = shalt.err (!%p947_p11)
}
 0x212   : > { %s1010_s8 = smov 256  }
 0x213   : > { %779 = dma.vmem_to_hbm [thread:$0]  (%p1103_p7), %s651_s11, 512, %s653_s12, %s638_s10, %s1010_s8, %s1010_s8, %s999_s20  }
 0x214 PF: > { %s667_s27 = sand.u32 1, %s981_s15   ;;  %p1272_p12 = scmp.ge.s32.totalorder %s993_s18, 2 }
 0x215   : > { %s668_s28 = scalar_lea.sflag [#allocation5], %s667_s27 }
 0x216   : > { %p790_p13 = pnand %p1272_p12, %p1071_p6 }
 0x218   : > { %p791_p0 = pneg %p790_p13 }
 0x21a   : > { %976 = dma.done.wait (%p791_p0), %s668_s28, 512  }
 0x21b   : > { %978 = vsyncadd (%p791_p0), %s668_s28, 4294966784  ;;  %p18_p3 = scmp.ge.s32.totalorder %s1089_s29, 4   ;;  %s1273_s15 = smov %s985_s16 }
 0x21c   : > { %s1274_s16 = smov %s989_s17  ;;  %s1275_s17 = smov %s1099_s6 }
 0x21d   : > { %s1276_s18 = smov %s1089_s29  ;;  %20 = sbr.rel (!%p18_p3) target bundleno = 6 (0x6), region = 98 }
 0x222   :  { %674 = vsyncpa [#allocation4], 1 }
 0x223   :  { %676 = vsyncpa [#allocation4 + $0x1], 1 }
 0x224   :  { %677 = vsyncpa [#allocation7], 1 }
 0x225   :  { %678 = vsyncpa [#allocation5], 1 }
 0x226   :  { %680 = vsyncpa [#allocation5 + $0x1], 1 }

</bundles_post_ra>
